<compile_context>
chip_gen: v7x
topology: tpu7x:2x2x1
jax: 0.10.0
libtpu: 0.0.40
codegen_flags: <defaults>
</compile_context>

<pallas_src>
import jax
import jax.numpy as jnp
from jax.experimental import pallas as pl
from jax.experimental.pallas import tpu as pltpu

IN_DIM = 10
N_HIDDEN_1 = 20
N_HIDDEN_2 = 30
OUT_DIM = 5

LANE = 128      # hidden slabs are one lane-tile wide
K2_PAD = 32     # contraction width for layer 2 (>= N_HIDDEN_1, cols 20..31 are zero)
K3_PAD = 32     # contraction width for layer 3 (>= N_HIDDEN_2, cols 30..31 are zero)
SUBLANE = 8


def _round_up(n, m):
    return ((n + m - 1) // m) * m


def _choose_tb(batch, tile_batch):
    # Multiple of 8 sublanes; capped so large batches produce >= 2 grid steps
    # (lets the "parallel" axis shard across v7x's two TensorCores).
    cap = _round_up(max(pl.cdiv(batch, 2), 1), SUBLANE)
    return max(SUBLANE, min(tile_batch, cap, _round_up(batch, SUBLANE)))


# ----------------------------- kernel ------------------------------------- #
def mlp_kernel(x_ref, w1_ref, b1_ref, w2_ref, b2_ref, w3_ref, b3_ref, o_ref):
    # Layer 1: true-K (=10) bf16 MXU matmul, f32 accumulate; bias + ReLU in f32.
    x = x_ref[...].astype(jnp.bfloat16)                              # (tb, 10)
    h1 = jnp.dot(x, w1_ref[...], preferred_element_type=jnp.float32)  # (tb, 128)
    h1 = jnp.maximum(h1 + b1_ref[...], 0.0)

    # Layer 2: contract only over the first 32 lanes (lanes 20..127 of h1 are
    # exact zeros because w1/b1 padding is zero and ReLU(0)=0).
    h1k = h1[:, :K2_PAD].astype(jnp.bfloat16)                        # (tb, 32)
    h2 = jnp.dot(h1k, w2_ref[...], preferred_element_type=jnp.float32)
    h2 = jnp.maximum(h2 + b2_ref[...], 0.0)

    # Layer 3 (no activation): full 128-lane MXU result, store only the 5 real
    # output lanes (narrow masked store; HBM writeback is the bottleneck, not
    # the store slot).
    h2k = h2[:, :K3_PAD].astype(jnp.bfloat16)                        # (tb, 32)
    out = jnp.dot(h2k, w3_ref[...], preferred_element_type=jnp.float32)
    out = out + b3_ref[...]
    o_ref[...] = out[:, :OUT_DIM].astype(o_ref.dtype)


# ----------------------------- wrapper ------------------------------------ #
def mlp_forward(x, packed_params, *, tile_batch=4096):
    """x: (batch, IN_DIM) f32. packed_params: lane-padded bf16 weights / f32 biases."""
    w1, b1, w2, b2, w3, b3 = packed_params
    batch = x.shape[0]

    tb = _choose_tb(batch, tile_batch)
    grid = (pl.cdiv(batch, tb),)   # trailing partial block handled by Pallas masking

    # Weights / biases: constant index map -> fetched once, VMEM-resident.
    const = lambda shape: pl.BlockSpec(shape, lambda i: (0, 0))

    param_bytes = sum(int(p.size) * p.dtype.itemsize for p in packed_params)
    cost = pl.CostEstimate(
        flops=2 * batch * (IN_DIM * N_HIDDEN_1
                           + N_HIDDEN_1 * N_HIDDEN_2
                           + N_HIDDEN_2 * OUT_DIM),
        transcendentals=0,
        bytes_accessed=batch * IN_DIM * 4 + batch * OUT_DIM * 4 + param_bytes,
    )

    return pl.pallas_call(
        mlp_kernel,
        out_shape=jax.ShapeDtypeStruct((batch, OUT_DIM), jnp.float32),
        grid=grid,
        in_specs=[
            pl.BlockSpec((tb, IN_DIM), lambda i: (i, 0)),   # streamed over batch
            const(w1.shape), const(b1.shape),
            const(w2.shape), const(b2.shape),
            const(w3.shape), const(b3.shape),
        ],
        out_specs=pl.BlockSpec((tb, OUT_DIM), lambda i: (i, 0)),
        compiler_params=pltpu.CompilerParams(
            dimension_semantics=("parallel",),              # megacore split on v7x
            vmem_limit_bytes=32 * 1024 * 1024,              # room for big batch tiles
        ),
        cost_estimate=cost,
    )(x, w1, b1, w2, b2, w3, b3)


# ----------------------------- params ------------------------------------- #
def init_params(key):
    """Deterministic init mirroring nn.Linear's U(-1/sqrt(fan_in), 1/sqrt(fan_in))."""
    keys = jax.random.split(key, 6)

    def linear(kw, kb, fan_in, fan_out):
        bound = 1.0 / jnp.sqrt(jnp.float32(fan_in))
        # Stored as [in, out] so the kernel computes x @ W (== x @ W_pt.T).
        w = jax.random.uniform(kw, (fan_in, fan_out), jnp.float32, -bound, bound)
        b = jax.random.uniform(kb, (fan_out,), jnp.float32, -bound, bound)
        return w, b

    w1, b1 = linear(keys[0], keys[1], IN_DIM, N_HIDDEN_1)
    w2, b2 = linear(keys[2], keys[3], N_HIDDEN_1, N_HIDDEN_2)
    w3, b3 = linear(keys[4], keys[5], N_HIDDEN_2, OUT_DIM)
    return (w1, b1, w2, b2, w3, b3)


def pack_params(params):
    """Zero-pad params to kernel shapes (done once, off the hot path).

    w1: (IN_DIM, 128)   bf16   (true K = 10)
    w2: (32, 128)       bf16   (K padded 20 -> 32)
    w3: (32, 128)       bf16   (K padded 30 -> 32; only first 5 output lanes real)
    b*: (1, 128)        f32
    """
    w1, b1, w2, b2, w3, b3 = params

    def pack_w(w, rows, cols):
        wp = jnp.zeros((rows, cols), jnp.float32)
        wp = wp.at[: w.shape[0], : w.shape[1]].set(w)
        return wp.astype(jnp.bfloat16)          # native MXU operand dtype

    def pack_b(b, cols):
        bp = jnp.zeros((1, cols), jnp.float32)   # bias add stays in f32
        return bp.at[0, : b.shape[0]].set(b)

    return (
        pack_w(w1, IN_DIM, LANE), pack_b(b1, LANE),
        pack_w(w2, K2_PAD, LANE), pack_b(b2, LANE),
        pack_w(w3, K3_PAD, LANE), pack_b(b3, LANE),
    )


def reference_forward(x, params):
    """Pure-JAX reference mirroring the kernel numerics (bf16 operands, f32 acc)."""
    w1, b1, w2, b2, w3, b3 = params

    def layer(h, w, b, relu):
        y = jnp.dot(h.astype(jnp.bfloat16), w.astype(jnp.bfloat16),
                    preferred_element_type=jnp.float32) + b
        return jnp.maximum(y, 0.0) if relu else y

    h1 = layer(x, w1, b1, True)
    h2 = layer(h1, w2, b2, True)
    return layer(h2, w3, b3, False)


# ------------------------------ main --------------------------------------- #
if __name__ == "__main__":
    key = jax.random.PRNGKey(0)
    k_params, k_x1, k_x2 = jax.random.split(key, 3)

    params = init_params(k_params)
    packed = pack_params(params)

    fwd = jax.jit(mlp_forward, static_argnames=("tile_batch",))

    # Small shape consistent with the module.
    batch = 8
    x = jax.random.normal(k_x1, (batch, IN_DIM), jnp.float32)
    out = jax.block_until_ready(fwd(x, packed))
    ref = reference_forward(x, params)
    assert out.shape == (batch, OUT_DIM), out.shape
    assert jnp.allclose(out, ref, atol=5e-3, rtol=5e-3), "mismatch vs reference (small)"

    # Exercise the multi-tile pipelined path (grid > 1, partial trailing block).
    big = 300
    x_big = jax.random.normal(k_x2, (big, IN_DIM), jnp.float32)
    out_big = jax.block_until_ready(fwd(x_big, packed, tile_batch=128))
    ref_big = reference_forward(x_big, params)
    assert out_big.shape == (big, OUT_DIM), out_big.shape
    assert jnp.allclose(out_big, ref_big, atol=5e-3, rtol=5e-3), "mismatch vs reference (tiled)"

    print("KERNEL_OK")
</pallas_src>

<mosaic_0001>
module attributes {stable_mosaic.version = 11 : i64} {
  func.func @mlp_kernel(%arg0: i32, %arg1: memref<8x10xf32, #tpu.memory_space<vmem>>, %arg2: memref<10x128xbf16, #tpu.memory_space<vmem>>, %arg3: memref<1x128xf32, #tpu.memory_space<vmem>>, %arg4: memref<32x128xbf16, #tpu.memory_space<vmem>>, %arg5: memref<1x128xf32, #tpu.memory_space<vmem>>, %arg6: memref<32x128xbf16, #tpu.memory_space<vmem>>, %arg7: memref<1x128xf32, #tpu.memory_space<vmem>>, %arg8: memref<8x5xf32, #tpu.memory_space<vmem>>) attributes {dimension_semantics = [#tpu.dimension_semantics<parallel>], iteration_bounds = array<i64: 1>, scalar_prefetch = 0 : i64, scratch_operands = 0 : i64, tpu.core_type = #tpu.core_type<tc>, window_params = [{transform_indices = @transform_0, window_bounds = array<i64: 8, 10>}, {pipeline_mode = #tpu.pipeline_mode<synchronous>, transform_indices = @transform_1, window_bounds = array<i64: 10, 128>}, {pipeline_mode = #tpu.pipeline_mode<synchronous>, transform_indices = @transform_2, window_bounds = array<i64: 1, 128>}, {pipeline_mode = #tpu.pipeline_mode<synchronous>, transform_indices = @transform_3, window_bounds = array<i64: 32, 128>}, {pipeline_mode = #tpu.pipeline_mode<synchronous>, transform_indices = @transform_4, window_bounds = array<i64: 1, 128>}, {pipeline_mode = #tpu.pipeline_mode<synchronous>, transform_indices = @transform_5, window_bounds = array<i64: 32, 128>}, {pipeline_mode = #tpu.pipeline_mode<synchronous>, transform_indices = @transform_6, window_bounds = array<i64: 1, 128>}, {transform_indices = @transform_7, window_bounds = array<i64: 8, 5>}]} {
    %c0 = arith.constant 0 : index
    %c0_0 = arith.constant 0 : index
    %0 = vector.load %arg1[%c0, %c0_0] : memref<8x10xf32, #tpu.memory_space<vmem>>, vector<8x10xf32>
    %1 = arith.truncf %0 : vector<8x10xf32> to vector<8x10xbf16>
    %c0_1 = arith.constant 0 : index
    %c0_2 = arith.constant 0 : index
    %2 = vector.load %arg2[%c0_1, %c0_2] : memref<10x128xbf16, #tpu.memory_space<vmem>>, vector<10x128xbf16>
    %cst = arith.constant dense<0.000000e+00> : vector<8x128xf32>
    %3 = tpu.matmul %1, %2, %cst {dimension_numbers = #tpu.dot_dimension_numbers<[1], [0], [0], [1], [0, 0, 1, 1], [], []>} : vector<8x10xbf16>, vector<10x128xbf16>, vector<8x128xf32> -> vector<8x128xf32>
    %c0_3 = arith.constant 0 : index
    %c0_4 = arith.constant 0 : index
    %4 = vector.load %arg3[%c0_3, %c0_4] : memref<1x128xf32, #tpu.memory_space<vmem>>, vector<1x128xf32>
    %5 = vector.broadcast %4 : vector<1x128xf32> to vector<8x128xf32>
    %6 = arith.addf %3, %5 : vector<8x128xf32>
    %cst_5 = arith.constant 0.000000e+00 : f32
    %7 = vector.broadcast %cst_5 : f32 to vector<8x128xf32>
    %8 = arith.maximumf %6, %7 : vector<8x128xf32>
    %9 = vector.extract_strided_slice %8 {offsets = [0, 0], sizes = [8, 32], strides = [1, 1]} : vector<8x128xf32> to vector<8x32xf32>
    %10 = arith.truncf %9 : vector<8x32xf32> to vector<8x32xbf16>
    %c0_6 = arith.constant 0 : index
    %c0_7 = arith.constant 0 : index
    %11 = vector.load %arg4[%c0_6, %c0_7] : memref<32x128xbf16, #tpu.memory_space<vmem>>, vector<32x128xbf16>
    %cst_8 = arith.constant dense<0.000000e+00> : vector<8x128xf32>
    %12 = tpu.matmul %10, %11, %cst_8 {dimension_numbers = #tpu.dot_dimension_numbers<[1], [0], [0], [1], [0, 0, 1, 1], [], []>} : vector<8x32xbf16>, vector<32x128xbf16>, vector<8x128xf32> -> vector<8x128xf32>
    %c0_9 = arith.constant 0 : index
    %c0_10 = arith.constant 0 : index
    %13 = vector.load %arg5[%c0_9, %c0_10] : memref<1x128xf32, #tpu.memory_space<vmem>>, vector<1x128xf32>
    %14 = vector.broadcast %13 : vector<1x128xf32> to vector<8x128xf32>
    %15 = arith.addf %12, %14 : vector<8x128xf32>
    %cst_11 = arith.constant 0.000000e+00 : f32
    %16 = vector.broadcast %cst_11 : f32 to vector<8x128xf32>
    %17 = arith.maximumf %15, %16 : vector<8x128xf32>
    %18 = vector.extract_strided_slice %17 {offsets = [0, 0], sizes = [8, 32], strides = [1, 1]} : vector<8x128xf32> to vector<8x32xf32>
    %19 = arith.truncf %18 : vector<8x32xf32> to vector<8x32xbf16>
    %c0_12 = arith.constant 0 : index
    %c0_13 = arith.constant 0 : index
    %20 = vector.load %arg6[%c0_12, %c0_13] : memref<32x128xbf16, #tpu.memory_space<vmem>>, vector<32x128xbf16>
    %cst_14 = arith.constant dense<0.000000e+00> : vector<8x128xf32>
    %21 = tpu.matmul %19, %20, %cst_14 {dimension_numbers = #tpu.dot_dimension_numbers<[1], [0], [0], [1], [0, 0, 1, 1], [], []>} : vector<8x32xbf16>, vector<32x128xbf16>, vector<8x128xf32> -> vector<8x128xf32>
    %c0_15 = arith.constant 0 : index
    %c0_16 = arith.constant 0 : index
    %22 = vector.load %arg7[%c0_15, %c0_16] : memref<1x128xf32, #tpu.memory_space<vmem>>, vector<1x128xf32>
    %23 = vector.broadcast %22 : vector<1x128xf32> to vector<8x128xf32>
    %24 = arith.addf %21, %23 : vector<8x128xf32>
    %25 = vector.extract_strided_slice %24 {offsets = [0, 0], sizes = [8, 5], strides = [1, 1]} : vector<8x128xf32> to vector<8x5xf32>
    %c0_17 = arith.constant 0 : index
    %c0_18 = arith.constant 0 : index
    %26 = vector.load %arg8[%c0_17, %c0_18] : memref<8x5xf32, #tpu.memory_space<vmem>>, vector<8x5xf32>
    tpu.vector_store %arg8[%c0_17, %c0_18], %25 {strides = array<i32>} : memref<8x5xf32, #tpu.memory_space<vmem>>, vector<8x5xf32>,
    return
  }
  func.func @transform_0(%arg0: i32) -> (i32, i32) {
    %c0_i32 = arith.constant 0 : i32
    %c0_i32_0 = arith.constant 0 : i32
    return %arg0, %c0_i32 : i32, i32
  }
  func.func @transform_1(%arg0: i32) -> (i32, i32) {
    %c0_i32 = arith.constant 0 : i32
    %c0_i32_0 = arith.constant 0 : i32
    %c0_i32_1 = arith.constant 0 : i32
    return %c0_i32, %c0_i32_0 : i32, i32
  }
  func.func @transform_2(%arg0: i32) -> (i32, i32) {
    %c0_i32 = arith.constant 0 : i32
    %c0_i32_0 = arith.constant 0 : i32
    %c0_i32_1 = arith.constant 0 : i32
    return %c0_i32, %c0_i32_0 : i32, i32
  }
  func.func @transform_3(%arg0: i32) -> (i32, i32) {
    %c0_i32 = arith.constant 0 : i32
    %c0_i32_0 = arith.constant 0 : i32
    %c0_i32_1 = arith.constant 0 : i32
    return %c0_i32, %c0_i32_0 : i32, i32
  }
  func.func @transform_4(%arg0: i32) -> (i32, i32) {
    %c0_i32 = arith.constant 0 : i32
    %c0_i32_0 = arith.constant 0 : i32
    %c0_i32_1 = arith.constant 0 : i32
    return %c0_i32, %c0_i32_0 : i32, i32
  }
  func.func @transform_5(%arg0: i32) -> (i32, i32) {
    %c0_i32 = arith.constant 0 : i32
    %c0_i32_0 = arith.constant 0 : i32
    %c0_i32_1 = arith.constant 0 : i32
    return %c0_i32, %c0_i32_0 : i32, i32
  }
  func.func @transform_6(%arg0: i32) -> (i32, i32) {
    %c0_i32 = arith.constant 0 : i32
    %c0_i32_0 = arith.constant 0 : i32
    %c0_i32_1 = arith.constant 0 : i32
    return %c0_i32, %c0_i32_0 : i32, i32
  }
  func.func @transform_7(%arg0: i32) -> (i32, i32) {
    %c0_i32 = arith.constant 0 : i32
    %c0_i32_0 = arith.constant 0 : i32
    return %arg0, %c0_i32 : i32, i32
  }
}

</mosaic_0001>

<bundles_post_ra>
// kernel: mlp_forward.1
= control target key start
LH: loop header
LB: loop body
LE: loop exit
PB: predicated region body
PF: predicated region fallthrough
CT: control target
= control target key end

     0   :  { %12 = vsyncpa [#allocation3], 0  ;;  %s551_s0 = inlined_call_operand.hbm [shape: f32[8,10], index: 0, kind: input, shape index: {}]   ;;  %s552_s1 = inlined_call_operand.hbm [shape: bf16[10,128], index: 1, kind: input, shape index: {}]   ;;  %s553_s2 = inlined_call_operand.vmem [shape: f32[1,128], index: 2, kind: input, shape index: {}]   ;;  %s554_s3 = inlined_call_operand.hbm [shape: bf16[32,128], index: 3, kind: input, shape index: {}]   ;;  %s555_s4 = inlined_call_operand.vmem [shape: f32[1,128], index: 4, kind: input, shape index: {}]   ;;  %s556_s5 = inlined_call_operand.vmem [shape: bf16[32,128], index: 5, kind: input, shape index: {}]   ;;  %s557_s6 = inlined_call_operand.vmem [shape: f32[1,128], index: 6, kind: input, shape index: {}]   ;;  %s558_s7 = inlined_call_operand.hbm [shape: f32[8,5], index: 7, kind: output, shape index: {}]  }
   0x1   :  { %13 = vsyncpa [#allocation6], 0 }
   0x2   :  { %14 = vsyncpa [#allocation4], 0  ;;  %s434_s24 = smov [#allocation5]   ;;  %s340_s28 = scalar_lea.hbm %s552_s1, 128 }
   0x3   :  { %s30_s25 = sshll.u32 %s434_s24, 4  ;;  %p341_p0 = scmp.ne.s32.totalorder %s552_s1, %s340_s28  ;;  %s31_s25 = int_to_ptr.vmem [resolvable:$true] %s30_s25 }
   0x4   :  { %p344_p1 = scmp.lt.u32.totalorder %s340_s28, %s552_s1 }
   0x6   :  { %p346_p2 = pnand %p344_p1, %p341_p0 }
   0x8   :  { %349 = shalt.err (!%p346_p2)
}
   0x9   :  { %s350_s10 = scalar_lea.vmem %s31_s25, 128  ;;  %p355_p4 = scmp.lt.s32.totalorder %s31_s25, %s31_s25 }
   0xa   :  { %p351_p3 = scmp.ne.s32.totalorder %s31_s25, %s350_s10  ;;  %p356_p5 = scmp.lt.s32.totalorder %s350_s10, %s350_s10 }
   0xc   :  { %p357_p6 = por %p356_p5, %p355_p4 }
   0xe   :  { %p358_p7 = pnand %p357_p6, %p351_p3 }
  0x10   :  { %361 = shalt.err (!%p358_p7)
}
  0x11   :  { %s435_s11 = smov 64   ;;  %s436_s12 = smov 4  }
  0x12   :  { %36 = dma.hbm_to_vmem [thread:$0]  %s552_s1, 128, %s31_s25, [#allocation6], %s435_s11, %s435_s11, %s436_s12  }
  0x13   :  { %s437_s15 = smov [#allocation2]   ;;  %s438_s17 = smov [#allocation7]  }
  0x14   :  { %s21_s16 = sshll.u32 %s437_s15, 4  ;;  %s44_s18 = sshll.u32 %s438_s17, 4  ;;  %s22_s16 = int_to_ptr.vmem [resolvable:$true] %s21_s16  ;;  %s45_s18 = int_to_ptr.vmem [resolvable:$true] %s44_s18 }
  0x15   :  { %s362_s21 = scalar_lea.hbm %s551_s0, 128 }
  0x16   :  { %p363_p8 = scmp.ne.s32.totalorder %s551_s0, %s362_s21  ;;  %p366_p9 = scmp.lt.u32.totalorder %s362_s21, %s551_s0 }
  0x18   :  { %p368_p10 = pnand %p366_p9, %p363_p8 }
  0x1a   :  { %371 = shalt.err (!%p368_p10)
}
  0x1b   :  { %s372_s1 = scalar_lea.vmem %s22_s16, 128  ;;  %p377_p12 = scmp.lt.s32.totalorder %s22_s16, %s22_s16 }
  0x1c   :  { %p373_p11 = scmp.ne.s32.totalorder %s22_s16, %s372_s1  ;;  %p378_p13 = scmp.lt.s32.totalorder %s372_s1, %s372_s1 }
  0x1e   :  { %p379_p0 = por %p378_p13, %p377_p12 }
  0x20   :  { %p380_p1 = pnand %p379_p0, %p373_p11 }
  0x22   :  { %383 = shalt.err (!%p380_p1)
}
  0x23   :  { %24 = dma.hbm_to_vmem [thread:$0]  %s551_s0, 128, %s22_s16, [#allocation3]  }
  0x24   :  { %s384_s30 = scalar_lea.hbm %s554_s3, 256 }
  0x25   :  { %p385_p2 = scmp.ne.s32.totalorder %s554_s3, %s384_s30  ;;  %p388_p3 = scmp.lt.u32.totalorder %s384_s30, %s554_s3 }
  0x27   :  { %p390_p4 = pnand %p388_p3, %p385_p2 }
  0x29   :  { %393 = shalt.err (!%p390_p4)
}
  0x2a   :  { %s394_s14 = scalar_lea.vmem %s45_s18, 256  ;;  %p399_p6 = scmp.lt.s32.totalorder %s45_s18, %s45_s18 }
  0x2b   :  { %p395_p5 = scmp.ne.s32.totalorder %s45_s18, %s394_s14  ;;  %p400_p7 = scmp.lt.s32.totalorder %s394_s14, %s394_s14 }
  0x2d   :  { %p401_p8 = por %p400_p7, %p399_p6 }
  0x2f   :  { %p402_p9 = pnand %p401_p8, %p395_p5 }
  0x31   :  { %405 = shalt.err (!%p402_p9)
}
  0x32   :  { %50 = dma.hbm_to_vmem [thread:$0]  %s554_s3, 256, %s45_s18, [#allocation6], %s435_s11, %s435_s11, %s436_s12  }
  0x33   :  { %428 = dma.done.wait [#allocation3], 128  }
  0x34   :  { %429 = vsyncadd [#allocation3], 4294967168 }
  0x35   :  { %430 = dma.done.wait [#allocation6], 384  }
  0x36   :  { %431 = vsyncadd [#allocation6], 4294966912  ;;  %v439_v0 = vmov 0.0   ;;  %vm440_vm0 = vmmov 0   ;;  %vm87_vm1 = vcmask 1044480   ;;  %v67_v2 = vld [vmem:[#allocation2] sm:$0xff] }
  0x37   :  { %305 = vmatprep.subr.bf16.mxu0 %v439_v0  ;;  %307 = vmatprep.mubr.msk.bf16.mxu0 %vm440_vm0, %v439_v0  ;;  %v335_v1 = vld [vmem:[#allocation5] sm:$0x1f]   ;;  %v68_v4 = vpack.c.bf16 %v67_v2, %v67_v2  ;;  %vm83_vm2 = vcmask 80896   ;;  %v336_v5 = vld [vmem:[#allocation7] sm:$0xff]   ;;  %v337_v6 = vld [vmem:[#allocation7 + $0x8] sm:$0xff]   ;;  %vm156_vm3 = vcmask 261120  }
  0x38   :  { %311 = vmatprep.subr.bf16.mxu1 %v439_v0  ;;  %315 = vmatprep.mubr.msk.bf16.mxu1 %vm440_vm0, %v439_v0  ;;  %v89_v3 = vsel %vm87_vm1, %v335_v1, 0  ;;  %v338_v7 = vld [vmem:[%s556_s5] sm:$0xff]   ;;  %v339_v16 = vld [vmem:[%s556_s5 + $0x8] sm:$0xff]   ;;  %s441_s22 = smov [#allocation8]   ;;  %vm268_vm4 = vcmask 39936  }
  0x39   :  { %306 = vmatpush3.bf16.msra.mxu0 %v89_v3  ;;  %312 = vmatpush3.bf16.msra.mxu1 %v336_v5  ;;  %v286_v8 = vld [vmem:[%s553_s2] ss:$0 sm:$0xff]  ;;  %s276_s23 = sshll.u32 %s441_s22, 4  ;;  %s277_s23 = int_to_ptr.vmem [resolvable:$true] %s276_s23 }
  0x3a   :  { %319 = vmatprep.subr.bf16.mxu0 %v439_v0  ;;  %313 = vmatprep.subr.bf16.mxu1 %v439_v0  ;;  %v289_v17 = vld [vmem:[%s555_s4] ss:$0 sm:$0xff]  ;;  %s406_s4 = scalar_lea.vmem %s277_s23, 128  ;;  %p411_p11 = scmp.lt.s32.totalorder %s277_s23, %s277_s23 }
  0x3b   :  { %v293_v25 = vld [vmem:[%s557_s6] ss:$0 sm:$0xff]  ;;  %p407_p10 = scmp.ne.s32.totalorder %s277_s23, %s406_s4  ;;  %p412_p12 = scmp.lt.s32.totalorder %s406_s4, %s406_s4 }
  0x3c   :  { %308 = vmatmul.mubr.msk.bf16.vlgmr.msra.gmra.mrb[0].mxu0 %vm83_vm2, %v68_v4 }
  0x3d   :  { %323 = vmatprep.mubr.msk.bf16.mxu0 %vm440_vm0, %v439_v0  ;;  %314 = vmatpush3.bf16.msra.mxu1 %v337_v6  ;;  %p413_p13 = por %p412_p12, %p411_p11 }
  0x3e   :  { %320 = vmatpush3.bf16.msra.mxu0 %v338_v7 }
  0x3f   :  { %321 = vmatprep.subr.bf16.mxu0 %v439_v0  ;;  %p414_p0 = pnand %p413_p13, %p407_p10 }
  0x42   :  { %322 = vmatpush3.bf16.msra.mxu0 %v339_v16 }
 0x10f   :  { %v125_v9 = vpop.f32.mrb[0].mxu0 }
 0x110   :  { %v126_v10 = vadd.f32 %v286_v8, %v125_v9  ;;  %v309_v11 = vpop.f32.mrb[1].mxu0 }
 0x111   :  { %v128_v12 = vpop.f32.mrb[2].mxu0 }
 0x112   :  { %v131_v13 = vmax.f32 %v126_v10, 0.0  ;;  %v310_v14 = vpop.f32.mrb[3].mxu0 }
 0x114   :  { %v132_v15 = vpack.c.bf16 %v131_v13, %v131_v13 }
 0x116   :  { %316 = vmatmul.mubr.msk.bf16.vlgmr.msra.gmra.mrb[0].mxu1 %vm156_vm3, %v132_v15 }
 0x1e9   :  { %v194_v18 = vpop.f32.mrb[0].mxu1 }
 0x1ea   :  { %v195_v19 = vadd.f32 %v289_v17, %v194_v18  ;;  %v317_v20 = vpop.f32.mrb[1].mxu1 }
 0x1eb   :  { %v197_v21 = vpop.f32.mrb[2].mxu1 }
 0x1ec   :  { %v200_v22 = vmax.f32 %v195_v19, 0.0  ;;  %v318_v23 = vpop.f32.mrb[3].mxu1 }
 0x1ee   :  { %v201_v24 = vpack.c.bf16 %v200_v22, %v200_v22 }
 0x1f0   :  { %324 = vmatmul.mubr.msk.bf16.vlgmr.msra.gmra.mrb[4].mxu0 %vm156_vm3, %v201_v24 }
 0x2c3   :  { %v262_v26 = vpop.f32.mrb[4].mxu0 }
 0x2c4   :  { %v263_v27 = vadd.f32 %v293_v25, %v262_v26  ;;  %v325_v28 = vpop.f32.mrb[5].mxu0 }
 0x2c5   :  { %v265_v29 = vpop.f32.mrb[6].mxu0 }
 0x2c6   :  { %v326_v30 = vpop.f32.mrb[7].mxu0  ;;  %269 = vst.msk [vmem:[#allocation8] sm:$0xff] %vm268_vm4, %v263_v27 }
 0x2c7   :  { %417 = shalt.err (!%p414_p0)
}
 0x2c8   :  { %s418_s6 = scalar_lea.hbm %s558_s7, 128 }
 0x2c9   :  { %p419_p1 = scmp.ne.s32.totalorder %s558_s7, %s418_s6  ;;  %p422_p2 = scmp.lt.u32.totalorder %s418_s6, %s558_s7 }
 0x2cb   :  { %p424_p3 = pnand %p422_p2, %p419_p1 }
 0x2cd   :  { %427 = shalt.err (!%p424_p3)
}
 0x2ce   :  { %279 = dma.vmem_to_hbm [thread:$0]  %s277_s23, 128, %s558_s7, [#allocation4]  }
 0x2cf   :  { %432 = dma.done.wait [#allocation4], 128  }
 0x2d0   :  { %433 = vsyncadd [#allocation4], 4294967168 }
 0x2d1   :  { %283 = vsyncpa [#allocation3], 1 }
 0x2d2   :  { %284 = vsyncpa [#allocation6], 1 }
 0x2d3   :  { %285 = vsyncpa [#allocation4], 1 }

</bundles_post_ra>
